<compile_context>
chip_gen: v5e
topology: v5e:2x2
jax: 0.10.0
libtpu: 0.0.40
codegen_flags: <defaults>
</compile_context>

<pallas_src>
import jax
import jax.numpy as jnp
from jax.experimental import pallas as pl
from jax.experimental.pallas import tpu as pltpu


# --------------------------------------------------------------------------- #
# Hardware-aware budgets
# --------------------------------------------------------------------------- #
def _vmem_capacity_bytes():
    """Physical VMEM per TensorCore (128 MiB v5e/v6e, 64 MiB v7x); safe fallback."""
    try:
        cap = getattr(pltpu.get_tpu_info(), "vmem_capacity_bytes", None)
        if cap:
            return int(cap)
    except Exception:
        pass
    return 64 * 1024 * 1024          # conservative: assume v7x-sized VMEM


# --------------------------------------------------------------------------- #
# Fused kernel: avg-pool + cSE MLP + sSE + combine -> one HBM read/write of x.
# Grid = (B,), block = full (C, HW) per-batch slab.
# --------------------------------------------------------------------------- #
def _scse_fused_kernel(x_ref, w1t_ref, b1_ref, w2_ref, b2_ref, ws_ref, bs_ref, o_ref):
    # x_ref:   (C, HW)   per-batch slab, channels on sublanes, pixels on lanes
    # w1t_ref: (C, Cr)   first 1x1-conv weight, transposed (f32)
    # b1_ref:  (1, Cr)   first bias (f32)
    # w2_ref:  (C, Cr)   second 1x1-conv weight (f32)
    # b2_ref:  (C, 1)    second bias (f32)
    # ws_ref:  (C, 1)    sSE 1x1-conv weight (f32)
    # bs_ref:  (1, 1)    sSE bias (SMEM scalar, f32)
    x = x_ref[...]                                    # native dtype (f32 or bf16)
    hw = x.shape[1]

    # ---- cSE: global average pool (lane reduce, f32 accumulate) + tiny MLP ----
    pooled = jnp.sum(x.astype(jnp.float32), axis=1, keepdims=True) * (1.0 / hw)    # (C, 1)
    # layer 1: h[r] = relu(sum_c pooled[c] * w1[r, c] + b1[r])  (VPU mul + XLU sublane reduce)
    h = jnp.maximum(
        jnp.sum(pooled * w1t_ref[...], axis=0, keepdims=True) + b1_ref[...], 0.0)   # (1, Cr)
    # layer 2: cse[c] = sigmoid(sum_r h[r] * w2[c, r] + b2[c])  (VPU mul + XLU lane reduce)
    cse = jax.nn.sigmoid(
        jnp.sum(w2_ref[...] * h, axis=1, keepdims=True) + b2_ref[...])              # (C, 1)

    # ---- sSE: per-pixel 1x1 conv; multiply in native dtype, accumulate in f32 ----
    ws = ws_ref[...].astype(x.dtype)                                                # (C, 1)
    sse_logit = jnp.sum((x * ws).astype(jnp.float32), axis=0, keepdims=True)        # (1, HW)
    sse = jax.nn.sigmoid(sse_logit + bs_ref[0, 0])                                  # (1, HW)

    # ---- combine: out = x * (cSE + sSE), single fused multiply in native dtype ----
    scale = cse.astype(x.dtype) + sse.astype(x.dtype)                               # (C, HW)
    o_ref[...] = (x * scale).astype(o_ref.dtype)


# --------------------------------------------------------------------------- #
# Streaming apply kernel (two-pass fallback): cSE precomputed, sSE + combine here.
# --------------------------------------------------------------------------- #
def _scse_apply_kernel(x_ref, cse_ref, ws_ref, bs_ref, o_ref):
    # x_ref:   (C, T)  current (batch, hw-tile) slab
    # cse_ref: (C, 1)  precomputed per-channel excitation for this batch element (f32)
    # ws_ref:  (C, 1)  sSE 1x1-conv weight (f32)
    # bs_ref:  (1, 1)  sSE bias (SMEM scalar, f32)
    x = x_ref[...]
    ws = ws_ref[...].astype(x.dtype)
    sse = jax.nn.sigmoid(
        jnp.sum((x * ws).astype(jnp.float32), axis=0, keepdims=True) + bs_ref[0, 0])  # (1, T)
    scale = cse_ref[...].astype(x.dtype) + sse.astype(x.dtype)                        # (C, T)
    o_ref[...] = (x * scale).astype(o_ref.dtype)


def _pick_hw_tile(hw, c, itemsize, per_block_budget, batch):
    """Lane-dense HW tile for the streaming path.

    Largest multiple of 128 that (a) stays within the per-block VMEM budget,
    (b) leaves enough grid steps for megacore sharding + DMA pipelining, and
    (c) divides HW exactly when a >=512-lane divisor exists; otherwise the grid
    uses cdiv(HW, T) with a masked (padded) last tile.
    """
    lane = 128
    budget_t = max(lane, (per_block_budget // max(1, c * itemsize)) // lane * lane)
    # Aim for >= ~8 total grid steps (both v7x TensorCores + pipeline depth), but
    # never shrink below 512 lanes to get them (128-lane tiles are ~3x off roofline).
    want_steps_per_b = max(1, -(-8 // max(1, batch)))
    step_t = max(512, (-(-hw // want_steps_per_b)) // lane * lane)
    max_t = min(budget_t, step_t)
    if hw <= max_t:
        return hw                        # single full-row block (block == full dim is legal)
    best = 0
    for t in range(lane, max_t + 1, lane):
        if hw % t == 0:
            best = t
    if best >= 512:
        return best                      # exact division, all stores lane-dense and full
    # No good multiple-of-128 divisor <= max_t: biggest lane-dense tile, masked last tile.
    return max_t


def _cse_params_for_kernel(params, C):
    w1 = params["w1"].astype(jnp.float32)             # (Cr, C)
    cr = w1.shape[0]
    return {
        "w1t": jnp.transpose(w1),                                    # (C, Cr)
        "b1": params["b1"].reshape(1, cr).astype(jnp.float32),       # (1, Cr)
        "w2": params["w2"].astype(jnp.float32),                      # (C, Cr)
        "b2": params["b2"].reshape(C, 1).astype(jnp.float32),        # (C, 1)
        "ws": params["ws"].reshape(C, 1).astype(jnp.float32),        # (C, 1)
        "bs": params["bs"].reshape(1, 1).astype(jnp.float32),        # (1, 1) SMEM scalar
    }


def scse_pallas(x_nchw, params, *, force_two_pass=False):
    """SCSE forward. x_nchw: (B, C, H, W). params: dense 1x1-conv weights (PyTorch layout)."""
    B, C, H, W = x_nchw.shape
    HW = H * W
    dtype = x_nchw.dtype
    itemsize = jnp.dtype(dtype).itemsize

    x = x_nchw.reshape(B, C, HW)          # free layout change (no transpose, no HBM pass)
    p = _cse_params_for_kernel(params, C)
    cr = p["w1t"].shape[1]

    vmem_cap = _vmem_capacity_bytes()
    vmem_limit = min((3 * vmem_cap) // 4, 96 * 1024 * 1024)   # ~48 MiB on v7x, 96 MiB on v5e/v6e
    slab_bytes = C * HW * itemsize

    # ---------------- fused single-HBM-read path ----------------
    # 4 double-buffered I/O slabs + elementwise intermediates must fit the VMEM limit.
    if not force_two_pass and 8 * slab_bytes <= vmem_limit:
        cost = pl.CostEstimate(
            flops=6 * B * C * HW,
            transcendentals=B * (HW + C),
            bytes_accessed=2 * B * C * HW * itemsize,
        )
        out = pl.pallas_call(
            _scse_fused_kernel,
            out_shape=jax.ShapeDtypeStruct((B, C, HW), dtype),
            grid_spec=pltpu.PrefetchScalarGridSpec(
                num_scalar_prefetch=0,
                grid=(B,),
                in_specs=[
                    pl.BlockSpec((None, C, HW), lambda b: (b, 0, 0)),      # x slab
                    pl.BlockSpec((C, cr), lambda b: (0, 0)),               # w1t
                    pl.BlockSpec((1, cr), lambda b: (0, 0)),               # b1
                    pl.BlockSpec((C, cr), lambda b: (0, 0)),               # w2
                    pl.BlockSpec((C, 1), lambda b: (0, 0)),                # b2
                    pl.BlockSpec((C, 1), lambda b: (0, 0)),                # ws
                    pl.BlockSpec(memory_space=pltpu.MemorySpace.SMEM),     # bs scalar
                ],
                out_specs=pl.BlockSpec((None, C, HW), lambda b: (b, 0, 0)),
            ),
            compiler_params=pltpu.CompilerParams(
                dimension_semantics=("parallel",),     # batch steps shard across v7x cores
                vmem_limit_bytes=vmem_limit,
            ),
            cost_estimate=cost,
        )(x, p["w1t"], p["b1"], p["w2"], p["b2"], p["ws"], p["bs"])
        return out.reshape(B, C, H, W)

    # ---------------- streaming two-pass fallback ----------------
    # cSE branch on the tiny pooled (B, C) vector runs in XLA (extra HBM read of x is
    # unavoidable here because the slab does not fit VMEM).
    pooled = jnp.mean(x.astype(jnp.float32), axis=2)                          # (B, C)
    h = jnp.maximum(pooled @ p["w1t"] + p["b1"], 0.0)                         # (B, Cr)
    cse = jax.nn.sigmoid(h @ p["w2"].T + p["b2"].reshape(1, C))               # (B, C)
    cse = cse.reshape(B, C, 1).astype(jnp.float32)

    T = _pick_hw_tile(HW, C, itemsize, vmem_cap // 8, B)
    n_hw = pl.cdiv(HW, T)
    cost = pl.CostEstimate(
        flops=5 * B * C * HW,
        transcendentals=B * HW,
        bytes_accessed=2 * B * C * HW * itemsize,
    )
    out = pl.pallas_call(
        _scse_apply_kernel,
        out_shape=jax.ShapeDtypeStruct((B, C, HW), dtype),
        grid_spec=pltpu.PrefetchScalarGridSpec(
            num_scalar_prefetch=0,
            grid=(B, n_hw),
            in_specs=[
                pl.BlockSpec((None, C, T), lambda b, t: (b, 0, t)),        # x tile (C, T)
                pl.BlockSpec((None, C, 1), lambda b, t: (b, 0, 0)),        # cse for batch b
                pl.BlockSpec((C, 1), lambda b, t: (0, 0)),                 # ws
                pl.BlockSpec(memory_space=pltpu.MemorySpace.SMEM),         # bs scalar
            ],
            out_specs=pl.BlockSpec((None, C, T), lambda b, t: (b, 0, t)),
        ),
        compiler_params=pltpu.CompilerParams(
            dimension_semantics=("parallel", "parallel"),
            vmem_limit_bytes=vmem_limit,
        ),
        cost_estimate=cost,
    )(x, cse, p["ws"], p["bs"])
    return out.reshape(B, C, H, W)


def scse_reference(x_nchw, params):
    """Pure-JAX reference mirroring the PyTorch forward (NCHW)."""
    x = x_nchw.astype(jnp.float32)
    pooled = jnp.mean(x, axis=(2, 3))                                     # (B, C)
    h = jnp.maximum(pooled @ params["w1"].T + params["b1"], 0.0)          # (B, Cr)
    cse = jax.nn.sigmoid(h @ params["w2"].T + params["b2"])               # (B, C)
    cse = cse[:, :, None, None]
    sse = jax.nn.sigmoid(
        jnp.einsum("bchw,oc->bohw", x, params["ws"])
        + params["bs"][None, :, None, None])
    return x * cse + x * sse


def init_params(key, in_channels, reduction=16):
    cr = in_channels // reduction
    k1, k2, k3 = jax.random.split(key, 3)
    return {
        # 1x1 convs stored as dense (out, in) matrices (PyTorch Conv2d weight squeezed).
        "w1": 0.1 * jax.random.normal(k1, (cr, in_channels), jnp.float32),
        "b1": jnp.zeros((cr,), jnp.float32),
        "w2": 0.1 * jax.random.normal(k2, (in_channels, cr), jnp.float32),
        "b2": jnp.zeros((in_channels,), jnp.float32),
        "ws": 0.1 * jax.random.normal(k3, (1, in_channels), jnp.float32),
        "bs": jnp.zeros((1,), jnp.float32),
    }


if __name__ == "__main__":
    key = jax.random.PRNGKey(0)
    kx, kp = jax.random.split(key)

    B, C, H, W = 2, 32, 16, 16          # in_channels=32, reduction=16 -> mid channels = 2
    x = jax.random.normal(kx, (B, C, H, W), jnp.float32)
    params = init_params(kp, C, reduction=16)

    ref = scse_reference(x, params)

    # Fused single-HBM-read path (default for slabs that fit VMEM).
    out = jax.block_until_ready(scse_pallas(x, params))
    assert out.shape == (B, C, H, W)
    assert jnp.allclose(out, ref, rtol=1e-4, atol=1e-4), "fused path mismatch vs reference"

    # Streaming two-pass fallback path (forced here just to keep it exercised).
    out2 = jax.block_until_ready(scse_pallas(x, params, force_two_pass=True))
    assert jnp.allclose(out2, ref, rtol=1e-4, atol=1e-4), "streaming path mismatch vs reference"

    # bf16 input exercises the native-dtype (v6e/v7x-friendly) compute path.
    xb = x.astype(jnp.bfloat16)
    out3 = jax.block_until_ready(scse_pallas(xb, params))
    assert out3.dtype == jnp.bfloat16
    ref_b = scse_reference(xb.astype(jnp.float32), params)
    assert jnp.allclose(out3.astype(jnp.float32), ref_b, rtol=5e-2, atol=5e-2), \
        "bf16 fused path mismatch vs reference"

    print("KERNEL_OK")
</pallas_src>

<mosaic_0001>
module attributes {stable_mosaic.version = 11 : i64} {
  func.func @_scse_fused_kernel(%arg0: i32, %arg1: memref<1x32x256xf32, #tpu.memory_space<vmem>>, %arg2: memref<32x2xf32, #tpu.memory_space<vmem>>, %arg3: memref<1x2xf32, #tpu.memory_space<vmem>>, %arg4: memref<32x2xf32, #tpu.memory_space<vmem>>, %arg5: memref<32x1xf32, #tpu.memory_space<vmem>>, %arg6: memref<32x1xf32, #tpu.memory_space<vmem>>, %arg7: memref<1x1xf32, #tpu.memory_space<smem>>, %arg8: memref<1x32x256xf32, #tpu.memory_space<vmem>>) attributes {dimension_semantics = [#tpu.dimension_semantics<parallel>], iteration_bounds = array<i64: 2>, scalar_prefetch = 0 : i64, scratch_operands = 0 : i64, tpu.core_type = #tpu.core_type<tc>, window_params = [{transform_indices = @transform_0, window_bounds = array<i64: 1, 32, 256>}, {pipeline_mode = #tpu.pipeline_mode<synchronous>, transform_indices = @transform_1, window_bounds = array<i64: 32, 2>}, {pipeline_mode = #tpu.pipeline_mode<synchronous>, transform_indices = @transform_2, window_bounds = array<i64: 1, 2>}, {pipeline_mode = #tpu.pipeline_mode<synchronous>, transform_indices = @transform_3, window_bounds = array<i64: 32, 2>}, {pipeline_mode = #tpu.pipeline_mode<synchronous>, transform_indices = @transform_4, window_bounds = array<i64: 32, 1>}, {pipeline_mode = #tpu.pipeline_mode<synchronous>, transform_indices = @transform_5, window_bounds = array<i64: 32, 1>}, {transform_indices = @transform_6, window_bounds = array<i64: 1, 1>}, {transform_indices = @transform_7, window_bounds = array<i64: 1, 32, 256>}]} {
    %c0 = arith.constant 0 : index
    %c0_0 = arith.constant 0 : index
    %c0_1 = arith.constant 0 : index
    %0 = vector.load %arg1[%c0, %c0_0, %c0_1] : memref<1x32x256xf32, #tpu.memory_space<vmem>>, vector<1x32x256xf32>
    %1 = vector.shape_cast %0 : vector<1x32x256xf32> to vector<32x256xf32>
    %cst = arith.constant dense<0.000000e+00> : vector<32xf32>
    %2 = vector.multi_reduction <add>, %1, %cst [1] : vector<32x256xf32> to vector<32xf32>
    %3 = vector.shape_cast %2 : vector<32xf32> to vector<32x1xf32>
    %cst_2 = arith.constant 3.906250e-03 : f32
    %4 = vector.broadcast %cst_2 : f32 to vector<32x1xf32>
    %5 = arith.mulf %3, %4 : vector<32x1xf32>
    %c0_3 = arith.constant 0 : index
    %c0_4 = arith.constant 0 : index
    %6 = vector.load %arg2[%c0_3, %c0_4] : memref<32x2xf32, #tpu.memory_space<vmem>>, vector<32x2xf32>
    %7 = vector.broadcast %5 : vector<32x1xf32> to vector<32x2xf32>
    %8 = arith.mulf %7, %6 : vector<32x2xf32>
    %cst_5 = arith.constant dense<0.000000e+00> : vector<2xf32>
    %9 = vector.multi_reduction <add>, %8, %cst_5 [0] : vector<32x2xf32> to vector<2xf32>
    %10 = vector.shape_cast %9 : vector<2xf32> to vector<1x2xf32>
    %c0_6 = arith.constant 0 : index
    %c0_7 = arith.constant 0 : index
    %11 = vector.load %arg3[%c0_6, %c0_7] : memref<1x2xf32, #tpu.memory_space<vmem>>, vector<1x2xf32>
    %12 = arith.addf %10, %11 : vector<1x2xf32>
    %cst_8 = arith.constant 0.000000e+00 : f32
    %13 = vector.broadcast %cst_8 : f32 to vector<1x2xf32>
    %14 = arith.maximumf %12, %13 : vector<1x2xf32>
    %c0_9 = arith.constant 0 : index
    %c0_10 = arith.constant 0 : index
    %15 = vector.load %arg4[%c0_9, %c0_10] : memref<32x2xf32, #tpu.memory_space<vmem>>, vector<32x2xf32>
    %16 = vector.broadcast %14 : vector<1x2xf32> to vector<32x2xf32>
    %17 = arith.mulf %15, %16 : vector<32x2xf32>
    %cst_11 = arith.constant dense<0.000000e+00> : vector<32xf32>
    %18 = vector.multi_reduction <add>, %17, %cst_11 [1] : vector<32x2xf32> to vector<32xf32>
    %19 = vector.shape_cast %18 : vector<32xf32> to vector<32x1xf32>
    %c0_12 = arith.constant 0 : index
    %c0_13 = arith.constant 0 : index
    %20 = vector.load %arg5[%c0_12, %c0_13] : memref<32x1xf32, #tpu.memory_space<vmem>>, vector<32x1xf32>
    %21 = arith.addf %19, %20 : vector<32x1xf32>
    %22 = arith.negf %21 : vector<32x1xf32>
    %23 = math.exp %22 : vector<32x1xf32>
    %cst_14 = arith.constant 1.000000e+00 : f32
    %24 = vector.broadcast %cst_14 : f32 to vector<32x1xf32>
    %25 = arith.addf %24, %23 : vector<32x1xf32>
    %26 = arith.divf %24, %25 : vector<32x1xf32>
    %c0_15 = arith.constant 0 : index
    %c0_16 = arith.constant 0 : index
    %27 = vector.load %arg6[%c0_15, %c0_16] : memref<32x1xf32, #tpu.memory_space<vmem>>, vector<32x1xf32>
    %28 = vector.broadcast %27 : vector<32x1xf32> to vector<32x256xf32>
    %29 = arith.mulf %1, %28 : vector<32x256xf32>
    %cst_17 = arith.constant dense<0.000000e+00> : vector<256xf32>
    %30 = vector.multi_reduction <add>, %29, %cst_17 [0] : vector<32x256xf32> to vector<256xf32>
    %31 = vector.shape_cast %30 : vector<256xf32> to vector<1x256xf32>
    %c0_18 = arith.constant 0 : index
    %c0_19 = arith.constant 0 : index
    %32 = memref.load %arg7[%c0_18, %c0_19] : memref<1x1xf32, #tpu.memory_space<smem>>
    %33 = vector.broadcast %32 : f32 to vector<1x256xf32>
    %34 = arith.addf %31, %33 : vector<1x256xf32>
    %35 = arith.negf %34 : vector<1x256xf32>
    %36 = math.exp %35 : vector<1x256xf32>
    %cst_20 = arith.constant 1.000000e+00 : f32
    %37 = vector.broadcast %cst_20 : f32 to vector<1x256xf32>
    %38 = arith.addf %37, %36 : vector<1x256xf32>
    %39 = arith.divf %37, %38 : vector<1x256xf32>
    %40 = vector.broadcast %26 : vector<32x1xf32> to vector<32x256xf32>
    %41 = vector.broadcast %39 : vector<1x256xf32> to vector<32x256xf32>
    %42 = arith.addf %40, %41 : vector<32x256xf32>
    %43 = arith.mulf %1, %42 : vector<32x256xf32>
    %c0_21 = arith.constant 0 : index
    %c0_22 = arith.constant 0 : index
    %c0_23 = arith.constant 0 : index
    %44 = vector.load %arg8[%c0_21, %c0_22, %c0_23] : memref<1x32x256xf32, #tpu.memory_space<vmem>>, vector<1x32x256xf32>
    %45 = vector.shape_cast %44 : vector<1x32x256xf32> to vector<32x256xf32>
    %46 = vector.shape_cast %43 : vector<32x256xf32> to vector<1x32x256xf32>
    tpu.vector_store %arg8[%c0_21, %c0_22, %c0_23], %46 {strides = array<i32>} : memref<1x32x256xf32, #tpu.memory_space<vmem>>, vector<1x32x256xf32>,
    return
  }
  func.func @transform_0(%arg0: i32) -> (i32, i32, i32) {
    %c0_i32 = arith.constant 0 : i32
    %c0_i32_0 = arith.constant 0 : i32
    %c0_i32_1 = arith.constant 0 : i32
    return %arg0, %c0_i32, %c0_i32_0 : i32, i32, i32
  }
  func.func @transform_1(%arg0: i32) -> (i32, i32) {
    %c0_i32 = arith.constant 0 : i32
    %c0_i32_0 = arith.constant 0 : i32
    %c0_i32_1 = arith.constant 0 : i32
    return %c0_i32, %c0_i32_0 : i32, i32
  }
  func.func @transform_2(%arg0: i32) -> (i32, i32) {
    %c0_i32 = arith.constant 0 : i32
    %c0_i32_0 = arith.constant 0 : i32
    %c0_i32_1 = arith.constant 0 : i32
    return %c0_i32, %c0_i32_0 : i32, i32
  }
  func.func @transform_3(%arg0: i32) -> (i32, i32) {
    %c0_i32 = arith.constant 0 : i32
    %c0_i32_0 = arith.constant 0 : i32
    %c0_i32_1 = arith.constant 0 : i32
    return %c0_i32, %c0_i32_0 : i32, i32
  }
  func.func @transform_4(%arg0: i32) -> (i32, i32) {
    %c0_i32 = arith.constant 0 : i32
    %c0_i32_0 = arith.constant 0 : i32
    %c0_i32_1 = arith.constant 0 : i32
    return %c0_i32, %c0_i32_0 : i32, i32
  }
  func.func @transform_5(%arg0: i32) -> (i32, i32) {
    %c0_i32 = arith.constant 0 : i32
    %c0_i32_0 = arith.constant 0 : i32
    %c0_i32_1 = arith.constant 0 : i32
    return %c0_i32, %c0_i32_0 : i32, i32
  }
  func.func @transform_6(%arg0: i32) -> (i32, i32) {
    %c0_i32 = arith.constant 0 : i32
    %c0_i32_0 = arith.constant 0 : i32
    %c0_i32_1 = arith.constant 0 : i32
    return %c0_i32, %c0_i32_0 : i32, i32
  }
  func.func @transform_7(%arg0: i32) -> (i32, i32, i32) {
    %c0_i32 = arith.constant 0 : i32
    %c0_i32_0 = arith.constant 0 : i32
    %c0_i32_1 = arith.constant 0 : i32
    return %arg0, %c0_i32, %c0_i32_0 : i32, i32, i32
  }
}

</mosaic_0001>

<bundles_post_ra>
// kernel: tpu_custom_call.1
= control target key start
LH: loop header
LB: loop body
LE: loop exit
PB: predicated region body
PF: predicated region fallthrough
CT: control target
= control target key end

     0   :  { %s1057_s0 = inlined_call_operand.vmem [shape: f32[2,32,256], index: 0, kind: input, shape index: {}]   ;;  %s1058_s1 = inlined_call_operand.vmem [shape: f32[32,2], index: 1, kind: input, shape index: {}]   ;;  %s1059_s2 = inlined_call_operand.vmem [shape: f32[1,2], index: 2, kind: input, shape index: {}]   ;;  %s1060_s3 = inlined_call_operand.vmem [shape: f32[32,2], index: 3, kind: input, shape index: {}]   ;;  %s1061_s4 = inlined_call_operand.vmem [shape: f32[32,1], index: 4, kind: input, shape index: {}]   ;;  %s1062_s5 = inlined_call_operand.vmem [shape: f32[32,1], index: 5, kind: input, shape index: {}]   ;;  %s1063_s6 = inlined_call_operand.<no memory space> [shape: f32[1,1], index: 6, kind: input, shape index: {}]   ;;  %s1064_s7 = inlined_call_operand.hbm [shape: f32[2,32,256], index: 7, kind: output, shape index: {}]  }
   0x1   :  { %12 = sst [smem:[#allocation2]] %s1063_s6 }
   0x2   :  { %13 = vsyncpa [#allocation4], 0 }
   0x3   :  { %15 = vsyncpa [#allocation4 + $0x1], 0  ;;  %s845_s26 = smov 0   ;;  %s847_s27 = smov 0  }
   0x4   :  { %s849_s28 = smov 0   ;;  %s851_s29 = smov 0  }
   0x5 LB: > { %s866_s6 = sadd.s32 4294967295, %s797_s29   ;;  %s646_s30 = sadd.s32 4294967294, %s797_s29   ;;  %s797_s29 = sphi %s851_s29, %s1072_s29   ;;  %s793_s28 = sphi %s849_s28, %s1071_s28   ;;  %s789_s27 = sphi %s847_s27, %s1070_s27   ;;  %s785_s26 = sphi %s845_s26, %s1069_s26  }
   0x6   : > { %s870_s8 = sadd.s32 1, %s797_s29   ;;  %s180_s9 = sadd.s32 1, %s793_s28 }
   0x7   : > { %s177_s10 = ssub.s32 %s797_s29, %s870_s8  ;;  %p190_p0 = scmp.ne.s32.totalorder %s793_s28, %s789_s27 }
   0x8   : > { %p178_p1 = scmp.eq.s32.totalorder %s177_s10, 0  ;;  %p191_p2 = scmp.eq.s32.totalorder %s866_s6, 1 }
   0x9   : > { %p196_p3 = scmp.ne.s32.totalorder %s789_s27, %s785_s26  ;;  %p197_p4 = scmp.eq.s32.totalorder %s646_s30, 1 }
   0xa   : > { %s881_s11 = scalar_select %p178_p1, %s793_s28, %s180_s9  }
   0xb   : > { %p883_p5 = por %p191_p2, %p190_p0  ;;  %p887_p6 = por %p197_p4, %p196_p3 }
   0xc   : > { %p649_p7 = scmp.ge.s32.totalorder %s797_s29, 1  ;;  %p241_p8 = scmp.lt.s32.totalorder %s797_s29, 3 }
   0xe   : > { %p242_p9 = pnand %p649_p7, %p241_p8 }
   0xf   : > { %p273_p10 = scmp.lt.s32.totalorder (!%p242_p9), %s866_s6, 1  ;;  %s482_s23 = sld [smem:[#allocation2]] (!%p242_p9) }
  0x10   : > { %245 = sbr.rel (%p242_p9) target bundleno = 473 (0x1d9), region = 48  ;;  %s270_s24 = sand.u32 (!%p242_p9), 1, %s789_s27  }
  0x11   : > { %s650_s25 = sshll.u32 (!%p242_p9), %s270_s24, 6  ;;  %s665_s9 = sshll.u32 (!%p242_p9), %s866_s6, 6 }
  0x12   : > { %s272_s30 = scalar_lea.vmem (!%p242_p9), [#allocation3], %s650_s25  ;;  %s580_s15 = scalar_lea.hbm (!%p242_p9), %s1064_s7, %s665_s9 }
  0x13   : > { %s755_s22 = scalar_lea.hbm (!%p242_p9), %s1064_s7, 128 }
  0x15   : > { %v432_v0 = vld [vmem:[%s1062_s5] sm:$0xff]  ;;  %v799_v1 = vmov 0   ;;  %s274_s16 = scalar_select %p273_p10, %s866_s6, 1  ;;  %v304_v19 = vld [vmem:[%s1058_s1 + $0x10] sm:$0xff]  ;;  %v303_v20 = vld [vmem:[%s1058_s1 + $0x8] sm:$0xff]  ;;  %vm310_vm0 = vcmask 15360  }
  0x16   : > { %708 = vset.pattern.permute.xlu2 %v799_v1  ;;  %709 = vset.pattern.permute.xlu0 %v799_v1  ;;  %v302_v17 = vld [vmem:[%s1058_s1] sm:$0xff]  ;;  %v305_v24 = vld [vmem:[%s1058_s1 + $0x18] sm:$0xff]  ;;  %v329_v47 = vld [vmem:[%s1060_s3 + $0x10] sm:$0xff]  ;;  %s569_s6 = scalar_lea.sflag [#allocation4], %s270_s24 }
  0x17   : > { %438 = vperm.xlu2 %708, %v432_v0   ;;  %710 = vset.pattern.permute.xlu1 %v799_v1  ;;  %s664_s17 = sshll.u32 %s274_s16, 6  ;;  %v324_v42 = vld [vmem:[%s1059_s2] sm:$0x1]  ;;  %v330_v46 = vld [vmem:[%s1060_s3 + $0x18] sm:$0xff]  ;;  %v328_v56 = vld [vmem:[%s1060_s3 + $0x8] sm:$0xff]  ;;  %s581_s16 = sshll.u32 %s272_s30, 4  ;;  %s582_s16 = int_to_ptr.vmem [resolvable:$true] %s581_s16 }
  0x18   : > { %s277_s20 = scalar_lea.vmem %s1057_s0, %s664_s17  ;;  %v327_v48 = vld [vmem:[%s1060_s3] sm:$0xff]  ;;  %v433_v59 = vld [vmem:[%s1062_s5 + $0x8] sm:$0xff]  ;;  %v434_v60 = vld [vmem:[%s1062_s5 + $0x10] sm:$0xff]  ;;  %s583_s17 = sshll.u32 %s580_s15, 4  ;;  %s584_s17 = int_to_ptr.hbm [resolvable:$true] %s583_s17 }
  0x19   : > { %v901_v2 = vld [vmem:[%s277_s20] sm:$0xff]  ;;  %v903_v3 = vld [vmem:[%s277_s20 + $0x8] sm:$0xff]  ;;  %v913_v8 = vld [vmem:[%s277_s20 + $0x10] sm:$0xff]  ;;  %s749_s18 = sshra.s32 %s584_s17, 4  ;;  %s750_s18 = int_to_ptr.hbm [resolvable:$true] %s749_s18 }
  0x1a   : > { %v905_v4 = vld [vmem:[%s277_s20 + $0x20] sm:$0xff]  ;;  %v286_v5 = vadd.f32 %v903_v3, %v901_v2  ;;  %v909_v6 = vld [vmem:[%s277_s20 + $0x28] sm:$0xff]  ;;  %v915_v9 = vld [vmem:[%s277_s20 + $0x18] sm:$0xff]  ;;  %s751_s19 = scalar_lea.hbm %s750_s18, 64  ;;  %p756_p0 = scmp.lt.s32.totalorder %s750_s18, %s1064_s7 }
  0x1b   : > { %v292_v7 = vadd.f32 %v909_v6, %v905_v4  ;;  %v917_v10 = vld [vmem:[%s277_s20 + $0x30] sm:$0xff]  ;;  %v919_v11 = vld [vmem:[%s277_s20 + $0x38] sm:$0xff]  ;;  %v289_v12 = vadd.f32 %v915_v9, %v913_v8  ;;  %v348_v1 = vld [vmem:[%s1061_s4] sm:$0xff]  ;;  %p752_p11 = scmp.ne.s32.totalorder %s750_s18, %s751_s19  ;;  %p757_p1 = scmp.lt.s32.totalorder %s755_s22, %s751_s19 }
  0x1c   : > { %287 = vadd.xlane.f32.xlu0 %v286_v5  ;;  %v295_v13 = vadd.f32 %v919_v11, %v917_v10  ;;  %v435_v61 = vld [vmem:[%s1062_s5 + $0x18] sm:$0xff]  ;;  %v350_v0 = vld [vmem:[%s1061_s4 + $0x10] sm:$0xff] }
  0x1d   : > { %293 = vadd.xlane.f32.xlu1 %v292_v7  ;;  %v351_v63 = vld [vmem:[%s1061_s4 + $0x18] sm:$0xff]  ;;  %p753_p12 = pnand %p752_p11, %p883_p5  ;;  %p758_p2 = por %p757_p1, %p756_p0 }
  0x1f   : > { %p754_p13 = pneg %p753_p12 }
  0x21   : > { %p759_p3 = pnand %p758_p2, %p754_p13 }
  0x24   : > { %290 = vadd.xlane.f32.xlu0 %v289_v12 }
  0x25   : > { %296 = vadd.xlane.f32.xlu1 %v295_v13 }
  0x71   : > { %v969_v62 = vpop.permute.xlu2 %438 }
  0x8f   : > { %v288_v14 = vpop.xlane.xlu0 %287 }
  0x90   : > { %v294_v15 = vpop.xlane.xlu1 %293  ;;  %v298_v16 = vmul.f32 0.00390625, %v288_v14 }
  0x91   : > { %v300_v18 = vmul.f32 0.00390625, %v294_v15 }
  0x92   : > { %v306_v22 = vmul.f32 %v302_v17, %v298_v16 }
  0x93   : > { %v308_v27 = vmul.f32 %v304_v19, %v300_v18  ;;  %v349_v19 = vld [vmem:[%s1061_s4 + $0x8] sm:$0xff] }
  0x94   : > { %v311_v30 = vsel %vm310_vm0, %v306_v22, 0.0 }
  0x95   : > { %v314_v33 = vsel %vm310_vm0, %v308_v27, 0.0 }
  0x97   : > { %v291_v21 = vpop.xlane.xlu0 %290 }
  0x98   : > { %v299_v23 = vmul.f32 0.00390625, %v291_v21  ;;  %v297_v25 = vpop.xlane.xlu1 %296 }
  0x99   : > { %v301_v26 = vmul.f32 0.00390625, %v297_v25 }
  0x9a   : > { %v307_v28 = vmul.f32 %v303_v20, %v299_v23 }
  0x9b   : > { %v309_v29 = vmul.f32 %v305_v24, %v301_v26 }
  0x9c   : > { %v312_v31 = vsel %vm310_vm0, %v307_v28, 0.0 }
  0x9d   : > { %v313_v32 = vadd.f32 %v312_v31, %v311_v30  ;;  %v316_v34 = vsel %vm310_vm0, %v309_v29, 0.0 }
  0x9f   : > { %v315_v35 = vadd.f32 %v314_v33, %v313_v32 }
  0xa1   : > { %v317_v36 = vadd.f32 %v316_v34, %v315_v35 }
  0xa3   : > { %v318_v37 = vrot.slane %v317_v36, 4 }
  0xa5   : > { %v319_v38 = vadd.f32 %v318_v37, %v317_v36 }
  0xa7   : > { %v320_v39 = vrot.slane %v319_v38, 2 }
  0xa9   : > { %v321_v40 = vadd.f32 %v320_v39, %v319_v38 }
  0xab   : > { %v322_v41 = vrot.slane %v321_v40, 1 }
  0xad   : > { %v323_v43 = vadd.f32 %v322_v41, %v321_v40 }
  0xaf   : > { %v325_v44 = vadd.f32 %v324_v42, %v323_v43 }
  0xb1   : > { %v326_v45 = vmax.f32 %v325_v44, 0.0 }
  0xb3   : > { %v331_v49 = vperm.slane %v326_v45, 0 }
  0xb5   : > { %v335_v50 = vmul.f32 %v331_v49, %v330_v46  ;;  %v334_v51 = vmul.f32 %v331_v49, %v329_v47  ;;  %v332_v52 = vmul.f32 %v331_v49, %v327_v48  ;;  %v333_v57 = vmul.f32 %v331_v49, %v328_v56 }
  0xb7   : > { %v345_v53 = vsel %vm310_vm0, %v335_v50, 0.0  ;;  %v342_v54 = vsel %vm310_vm0, %v334_v51, 0.0  ;;  %v336_v55 = vsel %vm310_vm0, %v332_v52, 0.0  ;;  %v339_v58 = vsel %vm310_vm0, %v333_v57, 0.0 }
  0xb8   : > { %346 = vadd.xlane.f32.xlu1 %v345_v53  ;;  %343 = vadd.xlane.f32.xlu0 %v342_v54  ;;  %v456_v57 = vmul.f32 %v969_v62, %v901_v2 }
  0xb9   : > { %337 = vadd.xlane.f32.xlu2 %v336_v55 }
  0xc1   : > { %340 = vadd.xlane.f32.xlu2 %v339_v58 }
  0xcc   : > { %443 = vperm.xlu0 %709, %v433_v59  }
  0xd1   : > { %448 = vperm.xlu1 %710, %v434_v60  }
  0xd9   : > { %453 = vperm.xlu2 %708, %v435_v61  }
 0x12b   : > { %v347_v5 = vpop.xlane.xlu1 %346  ;;  %v344_v7 = vpop.xlane.xlu0 %343 }
 0x12c   : > { %v355_v12 = vadd.f32 %v351_v63, %v347_v5  ;;  %v354_v13 = vadd.f32 %v350_v0, %v344_v7  ;;  %v338_v14 = vpop.xlane.xlu2 %337  ;;  %v457_v5 = vmul.f32 %v969_v62, %v903_v3 }
 0x12d   : > { %v352_v15 = vadd.f32 %v348_v1, %v338_v14 }
 0x12e   : > { %v655_v16 = vmul.f32 -1.442695, %v354_v13  ;;  %v656_v18 = vmul.f32 -1.442695, %v355_v12 }
 0x12f   : > { %v653_v17 = vmul.f32 -1.442695, %v352_v15 }
 0x130   : > { %711 = vpow2.f32 %v655_v16 }
 0x131   : > { %713 = vpow2.f32 %v653_v17 }
 0x132   : > { %715 = vpow2.f32 %v656_v18 }
 0x134   : > { %v341_v20 = vpop.xlane.xlu2 %340 }
 0x135   : > { %v353_v21 = vadd.f32 %v349_v19, %v341_v20 }
 0x136   : > { %v712_v22 = vpop.eup %711 }
 0x137   : > { %v714_v23 = vpop.eup %713  ;;  %v370_v24 = vadd.f32 1.0, %v712_v22  ;;  %v654_v25 = vmul.f32 -1.442695, %v353_v21 }
 0x138   : > { %v368_v26 = vadd.f32 1.0, %v714_v23  ;;  %v716_v27 = vpop.eup %715 }
 0x139   : > { %717 = vrcp.f32 %v370_v24  ;;  %v983_v28 = vadd.f32 1.0, %v716_v27  ;;  %v411_v52 = vand.u32 2147483647, %v370_v24  ;;  %v413_v53 = vand.u32 2147483648, %v370_v24 }
 0x13a   : > { %719 = vrcp.f32 %v368_v26  ;;  %v383_v37 = vand.u32 2147483648, %v368_v26  ;;  %v381_v39 = vand.u32 2147483647, %v368_v26  ;;  %vm377_vm2 = vweird.f32 %v368_v26 }
 0x13b   : > { %721 = vpow2.f32 %v654_v25  ;;  %vm407_vm6 = vweird.f32 %v370_v24  ;;  %vm412_vm9 = vcmp.eq.f32.partialorder %v411_v52, 8.507059e+37  ;;  %v414_v12 = vor.u32 1.1754944e-38, %v413_v53 }
 0x13c   : > { %723 = vrcp.f32 %v983_v28  ;;  %v384_v43 = vor.u32 1.1754944e-38, %v383_v37  ;;  %vm382_vm4 = vcmp.eq.f32.partialorder %v381_v39, 8.507059e+37  ;;  %v454_v16 = vpop.permute.xlu2 %453  ;;  %vm422_vm14 = vweird.f32 %v983_v28 }
 0x13d   : > { %v462_v23 = vmul.f32 %v454_v16, %v917_v10  ;;  %v463_v25 = vmul.f32 %v454_v16, %v919_v11 }
 0x13e   : > { %v444_v47 = vpop.permute.xlu0 %443 }
 0x13f   : > { %v718_v29 = vpop.eup %717  ;;  %v458_v54 = vmul.f32 %v444_v47, %v913_v8  ;;  %v459_v58 = vmul.f32 %v444_v47, %v915_v9 }
 0x140   : > { %v720_v30 = vpop.eup %719  ;;  %v403_v31 = vmul.f32 %v718_v29, %v370_v24  ;;  %vm408_vm5 = vweird.f32 %v718_v29 }
 0x141   : > { %v722_v32 = vpop.eup %721  ;;  %v373_v33 = vmul.f32 %v720_v30, %v368_v26  ;;  %vm378_vm1 = vweird.f32 %v720_v30  ;;  %vm995_vm7 = vmor %vm407_vm6, %vm408_vm5  ;;  %v464_v13 = vadd.f32 %v458_v54, %v456_v57  ;;  %v473_v17 = vadd.f32 %v459_v58, %v457_v5 }
 0x142   : > { %v369_v34 = vadd.f32 1.0, %v722_v32  ;;  %v404_v36 = vsub.f32 1.0, %v403_v31  ;;  %v986_v40 = vpop.eup %723  ;;  %vm379_vm3 = vmor %vm377_vm2, %vm378_vm1  ;;  %v428_v26 = vand.u32 2147483648, %v983_v28 }
 0x143   : > { %v374_v35 = vsub.f32 1.0, %v373_v33  ;;  %v418_v45 = vmul.f32 %v986_v40, %v983_v28  ;;  %v449_v49 = vpop.permute.xlu1 %448  ;;  %vm423_vm13 = vweird.f32 %v986_v40 }
 0x144   : > { %725 = vrcp.f32 %v369_v34  ;;  %v405_v42 = vmul.f32 %v718_v29, %v404_v36  ;;  %v460_v59 = vmul.f32 %v449_v49, %v905_v4  ;;  %v398_v61 = vand.u32 2147483648, %v369_v34  ;;  %vm424_vm15 = vmor %vm422_vm14, %vm423_vm13 }
 0x145   : > { %v375_v38 = vmul.f32 %v720_v30, %v374_v35  ;;  %v419_v56 = vsub.f32 1.0, %v418_v45  ;;  %v396_v1 = vand.u32 2147483647, %v369_v34  ;;  %v461_v7 = vmul.f32 %v449_v49, %v909_v6 }
 0x146   : > { %v406_v50 = vadd.f32 %v718_v29, %v405_v42  ;;  %vm392_vm10 = vweird.f32 %v369_v34  ;;  %v399_v19 = vor.u32 1.1754944e-38, %v398_v61  ;;  %v465_v20 = vadd.f32 %v464_v13, %v460_v59 }
 0x147   : > { %v376_v41 = vadd.f32 %v720_v30, %v375_v38  ;;  %v420_v15 = vmul.f32 %v986_v40, %v419_v56  ;;  %vm397_vm12 = vcmp.eq.f32.partialorder %v396_v1, 8.507059e+37  ;;  %v474_v22 = vadd.f32 %v473_v17, %v461_v7 }
 0x148   : > { %v410_v63 = vsel %vm995_vm7, %v718_v29, %v406_v50  ;;  %v466_v27 = vadd.f32 %v465_v20, %v462_v23  ;;  %v426_v29 = vand.u32 2147483647, %v983_v28  ;;  %v429_v32 = vor.u32 1.1754944e-38, %v428_v26 }
 0x149   : > { %v380_v44 = vsel %vm379_vm3, %v720_v30, %v376_v41  ;;  %v415_v18 = vsel %vm412_vm9, %v414_v12, %v410_v63  ;;  %v421_v24 = vadd.f32 %v986_v40, %v420_v15  ;;  %v475_v30 = vadd.f32 %v474_v22, %v463_v25 }
 0x14a   : > { %v726_v46 = vpop.eup %725  ;;  %v385_v48 = vsel %vm382_vm4, %v384_v43, %v380_v44  ;;  %v467_v33 = vrot.slane %v466_v27, 4  ;;  %vm427_vm0 = vcmp.eq.f32.partialorder %v426_v29, 8.507059e+37  ;;  %v483_v45 = vstv %s482_s23 }
 0x14b   : > { %526 = vperm.xlu2 %708, %v385_v48   ;;  %v388_v51 = vmul.f32 %v726_v46, %v369_v34  ;;  %vm393_vm8 = vweird.f32 %v726_v46  ;;  %v425_v31 = vsel %vm424_vm15, %v986_v40, %v421_v24  ;;  %v476_v34 = vrot.slane %v475_v30, 4 }
 0x14c   : > { %vm394_vm11 = vmor %vm392_vm10, %vm393_vm8  ;;  %v430_v35 = vsel %vm427_vm0, %v429_v32, %v425_v31  ;;  %v468_v36 = vadd.f32 %v467_v33, %v466_v27 }
 0x14d   : > { %v389_v55 = vsub.f32 1.0, %v388_v51  ;;  %v477_v37 = vadd.f32 %v476_v34, %v475_v30 }
 0x14e   : > { %v469_v38 = vrot.slane %v468_v36, 2 }
 0x14f   : > { %v390_v0 = vmul.f32 %v726_v46, %v389_v55  ;;  %v478_v39 = vrot.slane %v477_v37, 2 }
 0x150   : > { %v470_v41 = vadd.f32 %v469_v38, %v468_v36 }
 0x151   : > { %v391_v14 = vadd.f32 %v726_v46, %v390_v0  ;;  %v479_v42 = vadd.f32 %v478_v39, %v477_v37 }
 0x152   : > { %v471_v43 = vrot.slane %v470_v41, 1 }
 0x153   : > { %536 = vperm.xlu2 %708, %v415_v18   ;;  %v395_v21 = vsel %vm394_vm11, %v726_v46, %v391_v14  ;;  %v480_v44 = vrot.slane %v479_v42, 1 }
 0x154   : > { %v400_v62 = vsel %vm397_vm12, %v399_v19, %v395_v21  ;;  %v472_v28 = vadd.f32 %v471_v43, %v470_v41 }
 0x155   : > { %531 = vperm.xlu1 %710, %v400_v62   ;;  %v481_v46 = vadd.f32 %v480_v44, %v479_v42 }
 0x156   : > { %v484_v47 = vadd.f32 %v483_v45, %v472_v28 }
 0x157   : > { %v485_v40 = vadd.f32 %v483_v45, %v481_v46 }
 0x158   : > { %v657_v48 = vmul.f32 -1.442695, %v484_v47 }
 0x159   : > { %v658_v49 = vmul.f32 -1.442695, %v485_v40 }
 0x15a   : > { %727 = vpow2.f32 %v657_v48 }
 0x15b   : > { %729 = vpow2.f32 %v658_v49 }
 0x15d   : > { %541 = vperm.xlu1 %710, %v430_v35  }
 0x160   : > { %v728_v50 = vpop.eup %727 }
 0x161   : > { %v730_v51 = vpop.eup %729  ;;  %v492_v52 = vadd.f32 1.0, %v728_v50 }
 0x162   : > { %v493_v53 = vadd.f32 1.0, %v730_v51 }
 0x163   : > { %731 = vrcp.f32 %v492_v52  ;;  %vm499_vm3 = vweird.f32 %v492_v52  ;;  %v505_v1 = vand.u32 2147483648, %v492_v52  ;;  %v503_v7 = vand.u32 2147483647, %v492_v52 }
 0x164   : > { %733 = vrcp.f32 %v493_v53  ;;  %v520_v5 = vand.u32 2147483648, %v493_v53  ;;  %vm514_vm5 = vweird.f32 %v493_v53  ;;  %v518_v12 = vand.u32 2147483647, %v493_v53 }
 0x165   : > { %v506_v15 = vor.u32 1.1754944e-38, %v505_v1  ;;  %vm504_vm7 = vcmp.eq.f32.partialorder %v503_v7, 8.507059e+37 }
 0x166   : > { %v521_v16 = vor.u32 1.1754944e-38, %v520_v5  ;;  %vm519_vm8 = vcmp.eq.f32.partialorder %v518_v12, 8.507059e+37 }
 0x169   : > { %v732_v54 = vpop.eup %731 }
 0x16a   : > { %v734_v55 = vpop.eup %733  ;;  %v495_v56 = vmul.f32 %v732_v54, %v492_v52  ;;  %vm500_vm1 = vweird.f32 %v732_v54 }
 0x16b   : > { %v510_v57 = vmul.f32 %v734_v55, %v493_v53  ;;  %vm515_vm2 = vweird.f32 %v734_v55  ;;  %vm501_vm4 = vmor %vm499_vm3, %vm500_vm1 }
 0x16c   : > { %v496_v58 = vsub.f32 1.0, %v495_v56  ;;  %vm516_vm6 = vmor %vm514_vm5, %vm515_vm2 }
 0x16d   : > { %v511_v59 = vsub.f32 1.0, %v510_v57 }
 0x16e   : > { %v497_v60 = vmul.f32 %v732_v54, %v496_v58 }
 0x16f   : > { %v512_v61 = vmul.f32 %v734_v55, %v511_v59 }
 0x170   : > { %v498_v63 = vadd.f32 %v732_v54, %v497_v60 }
 0x171   : > { %v513_v0 = vadd.f32 %v734_v55, %v512_v61 }
 0x172   : > { %v502_v13 = vsel %vm501_vm4, %v732_v54, %v498_v63 }
 0x173   : > { %v517_v14 = vsel %vm516_vm6, %v734_v55, %v513_v0  ;;  %v507_v17 = vsel %vm504_vm7, %v506_v15, %v502_v13 }
 0x174   : > { %v522_v18 = vsel %vm519_vm8, %v521_v16, %v517_v14 }
 0x1a5   : > { %v527_v19 = vpop.permute.xlu2 %526 }
 0x1a6   : > { %v544_v20 = vadd.f32 %v527_v19, %v507_v17  ;;  %v545_v21 = vadd.f32 %v527_v19, %v522_v18 }
 0x1a8   : > { %v552_v22 = vmul.f32 %v544_v20, %v901_v2  ;;  %v553_v62 = vmul.f32 %v545_v21, %v903_v3 }
 0x1aa   : > { %560 = vst [vmem:[%s272_s30] sm:$0xff] %v552_v22 }
 0x1ab   : > { %561 = vst [vmem:[%s272_s30 + $0x8] sm:$0xff] %v553_v62 }
 0x1ad   : > { %v537_v23 = vpop.permute.xlu2 %536 }
 0x1ae   : > { %v548_v24 = vadd.f32 %v537_v23, %v507_v17  ;;  %v549_v25 = vadd.f32 %v537_v23, %v522_v18 }
 0x1b0   : > { %v556_v26 = vmul.f32 %v548_v24, %v905_v4  ;;  %v557_v27 = vmul.f32 %v549_v25, %v909_v6 }
 0x1b2   : > { %564 = vst [vmem:[%s272_s30 + $0x20] sm:$0xff] %v556_v26 }
 0x1b3   : > { %565 = vst [vmem:[%s272_s30 + $0x28] sm:$0xff] %v557_v27 }
 0x1c7   : > { %v532_v29 = vpop.permute.xlu1 %531 }
 0x1c8   : > { %v546_v30 = vadd.f32 %v532_v29, %v507_v17  ;;  %v547_v31 = vadd.f32 %v532_v29, %v522_v18 }
 0x1ca   : > { %v554_v2 = vmul.f32 %v546_v30, %v913_v8  ;;  %v555_v3 = vmul.f32 %v547_v31, %v915_v9 }
 0x1cc   : > { %562 = vst [vmem:[%s272_s30 + $0x10] sm:$0xff] %v554_v2 }
 0x1cd   : > { %563 = vst [vmem:[%s272_s30 + $0x18] sm:$0xff] %v555_v3 }
 0x1cf   : > { %v542_v4 = vpop.permute.xlu1 %541 }
 0x1d0   : > { %v550_v6 = vadd.f32 %v542_v4, %v507_v17  ;;  %v551_v32 = vadd.f32 %v542_v4, %v522_v18 }
 0x1d2   : > { %v558_v33 = vmul.f32 %v550_v6, %v917_v10  ;;  %v559_v34 = vmul.f32 %v551_v32, %v919_v11 }
 0x1d4   : > { %566 = vst [vmem:[%s272_s30 + $0x30] sm:$0xff] %v558_v33 }
 0x1d5   : > { %567 = vst [vmem:[%s272_s30 + $0x38] sm:$0xff] %v559_v34 }
 0x1d6   : > { %762 = shalt.err (!%p759_p3)
}
 0x1d7   : > { %s800_s24 = smov 256   ;;  %s801_s30 = smov 16  }
 0x1d8   : > { %666 = dma.vmem_to_hbm [thread:$0]  (%p883_p5), %s582_s16, 1024, %s584_s17, %s569_s6, %s800_s24, %s800_s24, %s801_s30  }
 0x1d9 PF: > { %p672_p4 = scmp.ge.s32.totalorder %s797_s29, 2  ;;  %s598_s9 = sand.u32 1, %s785_s26  }
 0x1da   : > { %s599_s10 = scalar_lea.sflag [#allocation4], %s598_s9 }
 0x1db   : > { %p669_p7 = pnand %p672_p4, %p887_p6 }
 0x1dd   : > { %p670_p8 = pneg %p669_p7 }
 0x1df   : > { %780 = dma.done.wait (%p670_p8), %s599_s10, 1024  }
 0x1e0   : > { %782 = vsyncadd (%p670_p8), %s599_s10, 4294966272  ;;  %p18_p9 = scmp.ge.s32.totalorder %s870_s8, 4   ;;  %s1069_s26 = smov %s789_s27 }
 0x1e1   : > { %s1070_s27 = smov %s793_s28  ;;  %s1071_s28 = smov %s881_s11 }
 0x1e2   : > { %s1072_s29 = smov %s870_s8  ;;  %20 = sbr.rel (!%p18_p9) target bundleno = 5 (0x5), region = 83 }
 0x1e7   :  { %605 = vsyncpa [#allocation4], 1 }
 0x1e8   :  { %607 = vsyncpa [#allocation4 + $0x1], 1 }

</bundles_post_ra>
